<compile_context>
chip_gen: v7x
topology: tpu7x:2x2x1
jax: 0.10.0
libtpu: 0.0.40
codegen_flags: <defaults>
</compile_context>

<pallas_src>
import jax
import jax.numpy as jnp
from jax.experimental import pallas as pl
from jax.experimental.pallas import tpu as pltpu

TEMPLATES = [
    'a photo of a {}.', 'This is a photo of a {}', 'There is a {} in the scene',
    'There is the {} in the scene', 'a photo of a {} in the scene',
    'a photo of a small {}.', 'a photo of a medium {}.', 'a photo of a large {}.',
    'This is a photo of a small {}.', 'This is a photo of a medium {}.',
    'This is a photo of a large {}.', 'There is a small {} in the scene.',
    'There is a medium {} in the scene.', 'There is a large {} in the scene.',
]


def _prompt_extractor_kernel(feats_ref, proj_ref, out_ref):
    """Project, per-row L2 norm, template-sum, final L2 norm for one noun block.

    feats_ref: [T, bn, D_model] VMEM  (bn is a multiple of 8)
    proj_ref : [D_model, D_embed] VMEM
    out_ref  : [bn, D_embed] VMEM
    """
    T, bn, Dm = feats_ref.shape
    De = proj_ref.shape[1]

    # encode_text tail: one fused MXU matmul over all (template, noun) rows of
    # this block.  Collapsing (T, bn) -> T*bn is a free sublane regroup because
    # bn is a multiple of 8.
    f = jnp.dot(feats_ref[...].reshape(T * bn, Dm), proj_ref[...],
                preferred_element_type=jnp.float32)                 # [T*bn, De]

    # Per-(template, noun) L2 normalization (dim=-1, keepdim).  No eps, same as
    # the CLIP/PyTorch reference (rsqrt(0) -> inf only for degenerate rows).
    fn = f * jax.lax.rsqrt(jnp.sum(f * f, axis=-1, keepdims=True))

    # Template reduction as an axis-0 sum (tree-reducible, not a 13-deep serial
    # chain).  The /T of the mean cancels under the final L2 normalization.
    acc = jnp.sum(fn.reshape(T, bn, De), axis=0)                    # [bn, De]

    # Final L2 normalization of the (mean-equivalent) feature.
    inv2 = jax.lax.rsqrt(jnp.sum(acc * acc, axis=-1, keepdims=True))
    out_ref[...] = (acc * inv2).astype(out_ref.dtype)


def predefined_prompt_extractor(eot_feats: jax.Array, text_proj: jax.Array,
                                *, block_n: int = 128) -> jax.Array:
    """eot_feats: [T, N, D_model] float32, text_proj: [D_model, D_embed] float32."""
    T, N, Dm = eot_feats.shape
    Dm2, De = text_proj.shape
    assert Dm == Dm2

    # Noun-block size: sublane aligned (multiple of 8), capped at `block_n`.
    bn = min(block_n, ((N + 7) // 8) * 8)
    bn = max(8, ((bn + 7) // 8) * 8)
    n_pad = ((N + bn - 1) // bn) * bn
    if n_pad != N:
        # Padded nouns are fully independent rows; their outputs are trimmed.
        eot_feats = jnp.pad(eot_feats, ((0, 0), (0, n_pad - N), (0, 0)))

    cost = pl.CostEstimate(
        flops=2 * T * n_pad * Dm * De,
        transcendentals=T * n_pad + n_pad,     # one rsqrt per normalized row
        bytes_accessed=4 * (T * n_pad * Dm + Dm * De + n_pad * De),
    )

    out = pl.pallas_call(
        _prompt_extractor_kernel,
        out_shape=jax.ShapeDtypeStruct((n_pad, De), jnp.float32),
        grid=(n_pad // bn,),
        in_specs=[
            # One noun block per grid step; T and D_model kept whole.
            pl.BlockSpec((T, bn, Dm), lambda i: (0, i, 0)),
            # Projection matrix resident across all steps.
            pl.BlockSpec((Dm, De), lambda i: (0, 0)),
        ],
        out_specs=pl.BlockSpec((bn, De), lambda i: (i, 0)),
        compiler_params=pltpu.CompilerParams(
            dimension_semantics=("parallel",)),
        cost_estimate=cost,
    )(eot_feats, text_proj)

    return out[:N]


def _reference(eot_feats, text_proj):
    f = jnp.einsum("tnd,de->tne", eot_feats, text_proj)
    f = f / jnp.linalg.norm(f, axis=-1, keepdims=True)
    m = f.mean(axis=0)
    return m / jnp.linalg.norm(m, axis=-1, keepdims=True)


if __name__ == "__main__":
    key = jax.random.PRNGKey(0)
    k1, k2 = jax.random.split(key)

    T = len(TEMPLATES)   # 14 templates
    N = 8                # number of nouns in noun_list
    D_MODEL = 64         # transformer width (small)
    D_EMBED = 32         # CLIP embed dim (small)

    # Deterministic synthetic stand-ins for (tokenize + transformer) EOT features
    # and for clip_model.text_projection.
    eot_feats = jax.random.normal(k1, (T, N, D_MODEL), dtype=jnp.float32)
    text_proj = jax.random.normal(k2, (D_MODEL, D_EMBED), dtype=jnp.float32) * 0.02

    out = predefined_prompt_extractor(eot_feats, text_proj)
    out = jax.block_until_ready(out)

    ref = _reference(eot_feats, text_proj)
    assert out.shape == (N, D_EMBED)
    assert jnp.allclose(out, ref, atol=1e-5, rtol=1e-5)

    # Also exercise the non-sublane-aligned noun-count path (padding + trim).
    N2 = 5
    out2 = jax.block_until_ready(
        predefined_prompt_extractor(eot_feats[:, :N2], text_proj))
    ref2 = _reference(eot_feats[:, :N2], text_proj)
    assert out2.shape == (N2, D_EMBED)
    assert jnp.allclose(out2, ref2, atol=1e-5, rtol=1e-5)

    print("KERNEL_OK")
</pallas_src>

<mosaic_0001>
module attributes {stable_mosaic.version = 11 : i64} {
  func.func @_prompt_extractor_kernel(%arg0: i32, %arg1: memref<14x8x64xf32, #tpu.memory_space<vmem>>, %arg2: memref<64x32xf32, #tpu.memory_space<vmem>>, %arg3: memref<8x32xf32, #tpu.memory_space<vmem>>) attributes {dimension_semantics = [#tpu.dimension_semantics<parallel>], iteration_bounds = array<i64: 1>, scalar_prefetch = 0 : i64, scratch_operands = 0 : i64, tpu.core_type = #tpu.core_type<tc>, window_params = [{transform_indices = @transform_0, window_bounds = array<i64: 14, 8, 64>}, {pipeline_mode = #tpu.pipeline_mode<synchronous>, transform_indices = @transform_1, window_bounds = array<i64: 64, 32>}, {transform_indices = @transform_2, window_bounds = array<i64: 8, 32>}]} {
    %c0 = arith.constant 0 : index
    %c0_0 = arith.constant 0 : index
    %c0_1 = arith.constant 0 : index
    %0 = vector.load %arg1[%c0, %c0_0, %c0_1] : memref<14x8x64xf32, #tpu.memory_space<vmem>>, vector<14x8x64xf32>
    %1 = vector.shape_cast %0 : vector<14x8x64xf32> to vector<112x64xf32>
    %c0_2 = arith.constant 0 : index
    %c0_3 = arith.constant 0 : index
    %2 = vector.load %arg2[%c0_2, %c0_3] : memref<64x32xf32, #tpu.memory_space<vmem>>, vector<64x32xf32>
    %cst = arith.constant dense<0.000000e+00> : vector<112x32xf32>
    %3 = tpu.matmul %1, %2, %cst {dimension_numbers = #tpu.dot_dimension_numbers<[1], [0], [0], [1], [0, 0, 1, 1], [], []>} : vector<112x64xf32>, vector<64x32xf32>, vector<112x32xf32> -> vector<112x32xf32>
    %4 = arith.mulf %3, %3 : vector<112x32xf32>
    %cst_4 = arith.constant dense<0.000000e+00> : vector<112xf32>
    %5 = vector.multi_reduction <add>, %4, %cst_4 [1] : vector<112x32xf32> to vector<112xf32>
    %6 = vector.shape_cast %5 : vector<112xf32> to vector<112x1xf32>
    %7 = math.rsqrt %6 : vector<112x1xf32>
    %8 = vector.broadcast %7 : vector<112x1xf32> to vector<112x32xf32>
    %9 = arith.mulf %3, %8 : vector<112x32xf32>
    %10 = vector.shape_cast %9 : vector<112x32xf32> to vector<14x8x32xf32>
    %cst_5 = arith.constant dense<0.000000e+00> : vector<8x32xf32>
    %11 = vector.multi_reduction <add>, %10, %cst_5 [0] : vector<14x8x32xf32> to vector<8x32xf32>
    %12 = arith.mulf %11, %11 : vector<8x32xf32>
    %cst_6 = arith.constant dense<0.000000e+00> : vector<8xf32>
    %13 = vector.multi_reduction <add>, %12, %cst_6 [1] : vector<8x32xf32> to vector<8xf32>
    %14 = vector.shape_cast %13 : vector<8xf32> to vector<8x1xf32>
    %15 = math.rsqrt %14 : vector<8x1xf32>
    %16 = vector.broadcast %15 : vector<8x1xf32> to vector<8x32xf32>
    %17 = arith.mulf %11, %16 : vector<8x32xf32>
    %c0_7 = arith.constant 0 : index
    %c0_8 = arith.constant 0 : index
    %18 = vector.load %arg3[%c0_7, %c0_8] : memref<8x32xf32, #tpu.memory_space<vmem>>, vector<8x32xf32>
    tpu.vector_store %arg3[%c0_7, %c0_8], %17 {strides = array<i32>} : memref<8x32xf32, #tpu.memory_space<vmem>>, vector<8x32xf32>,
    return
  }
  func.func @transform_0(%arg0: i32) -> (i32, i32, i32) {
    %c0_i32 = arith.constant 0 : i32
    %c0_i32_0 = arith.constant 0 : i32
    %c0_i32_1 = arith.constant 0 : i32
    return %c0_i32, %arg0, %c0_i32_0 : i32, i32, i32
  }
  func.func @transform_1(%arg0: i32) -> (i32, i32) {
    %c0_i32 = arith.constant 0 : i32
    %c0_i32_0 = arith.constant 0 : i32
    %c0_i32_1 = arith.constant 0 : i32
    return %c0_i32, %c0_i32_0 : i32, i32
  }
  func.func @transform_2(%arg0: i32) -> (i32, i32) {
    %c0_i32 = arith.constant 0 : i32
    %c0_i32_0 = arith.constant 0 : i32
    return %arg0, %c0_i32 : i32, i32
  }
}

</mosaic_0001>

<bundles_post_ra>
// kernel: tpu_custom_call.1
= control target key start
LH: loop header
LB: loop body
LE: loop exit
PB: predicated region body
PF: predicated region fallthrough
CT: control target
= control target key end

     0   :  { %7 = vsyncpa [#allocation3], 0  ;;  %s720_s0 = inlined_call_operand.hbm [shape: f32[14,8,64], index: 0, kind: input, shape index: {}]   ;;  %s721_s1 = inlined_call_operand.vmem [shape: f32[64,32], index: 1, kind: input, shape index: {}]   ;;  %s722_s2 = inlined_call_operand.hbm [shape: f32[8,32], index: 2, kind: output, shape index: {}]  }
   0x1   :  { %8 = vsyncpa [#allocation4], 0  ;;  %s539_s9 = smov [#allocation2]   ;;  %s491_s13 = scalar_lea.hbm %s720_s0, 1792 }
   0x2   :  { %s14_s10 = sshll.u32 %s539_s9, 4  ;;  %p492_p0 = scmp.ne.s32.totalorder %s720_s0, %s491_s13  ;;  %s15_s10 = int_to_ptr.vmem [resolvable:$true] %s14_s10 }
   0x3   :  { %p495_p1 = scmp.lt.u32.totalorder %s491_s13, %s720_s0 }
   0x5   :  { %p497_p2 = pnand %p495_p1, %p492_p0 }
   0x7   :  { %500 = shalt.err (!%p497_p2)
}
   0x8   :  { %s501_s18 = scalar_lea.vmem %s15_s10, 1792  ;;  %p506_p4 = scmp.lt.s32.totalorder %s15_s10, %s15_s10 }
   0x9   :  { %p502_p3 = scmp.ne.s32.totalorder %s15_s10, %s501_s18  ;;  %p507_p5 = scmp.lt.s32.totalorder %s501_s18, %s501_s18 }
   0xb   :  { %p508_p6 = por %p507_p5, %p506_p4 }
   0xd   :  { %p509_p7 = pnand %p508_p6, %p502_p3 }
   0xf   :  { %512 = shalt.err (!%p509_p7)
}
  0x10   :  { %s540_s19 = smov 128   ;;  %s541_s20 = smov 8  }
  0x11   :  { %20 = dma.hbm_to_vmem [thread:$0]  %s720_s0, 1792, %s15_s10, [#allocation3], %s540_s19, %s540_s19, %s541_s20  }
  0x12   :  { %535 = dma.done.wait [#allocation3], 1792  }
  0x13   :  { %536 = vsyncadd [#allocation3], 4294965504  ;;  %v40_v0 = vld [vmem:[%s721_s1] sm:$0xff]  ;;  %v41_v1 = vld [vmem:[%s721_s1 + $0x8] sm:$0xff]  ;;  %vm48_vm0 = vcmask 523264   ;;  %vm240_vm1 = vcmask 261120  }
  0x14   :  { %v42_v2 = vld [vmem:[%s721_s1 + $0x10] sm:$0xff]  ;;  %v433_v3 = vpack.c.bf16 %v41_v1, %v40_v0  ;;  %v43_v4 = vld [vmem:[%s721_s1 + $0x18] sm:$0xff]  ;;  %v44_v6 = vld [vmem:[%s721_s1 + $0x20] sm:$0xff] }
  0x15   :  { %v437_v5 = vpack.c.bf16 %v43_v4, %v42_v2  ;;  %v45_v7 = vld [vmem:[%s721_s1 + $0x28] sm:$0xff]  ;;  %v26_v8 = vld [vmem:[#allocation2] sm:$0xff]  ;;  %v46_v11 = vld [vmem:[%s721_s1 + $0x30] sm:$0xff] }
  0x16   :  { %434 = vmatprep.subr.bf16.mxu0 %v433_v3  ;;  %412 = vmatprep.mubr.msk.f32.mxu0 %vm48_vm0, %v26_v8  ;;  %v441_v9 = vpack.c.bf16 %v45_v7, %v44_v6  ;;  %v34_v10 = vld [vmem:[#allocation2 + $0x40] sm:$0xff]  ;;  %v47_v12 = vld [vmem:[%s721_s1 + $0x38] sm:$0xff]  ;;  %v27_v14 = vld [vmem:[#allocation2 + $0x8] sm:$0xff]  ;;  %s542_s1 = smov [#allocation5]  }
  0x17   :  { %436 = vmatpush3.bf16.msra.mxu0 %v433_v3  ;;  %449 = vmatprep.subr.bf16.mxu1 %v433_v3  ;;  %v445_v13 = vpack.c.bf16 %v47_v12, %v46_v11  ;;  %v28_v15 = vld [vmem:[#allocation2 + $0x10] sm:$0xff]  ;;  %v35_v16 = vld [vmem:[#allocation2 + $0x48] sm:$0xff]  ;;  %v29_v18 = vld [vmem:[#allocation2 + $0x18] sm:$0xff]  ;;  %s351_s10 = sshll.u32 %s542_s1, 4  ;;  %s352_s10 = int_to_ptr.vmem [resolvable:$true] %s351_s10 }
  0x18   :  { %438 = vmatprep.subr.bf16.mxu0 %v437_v5  ;;  %453 = vmatpush3.bf16.msra.mxu1 %v433_v3  ;;  %v36_v17 = vld [vmem:[#allocation2 + $0x50] sm:$0xff]  ;;  %v30_v19 = vld [vmem:[#allocation2 + $0x20] sm:$0xff]  ;;  %v37_v20 = vld [vmem:[#allocation2 + $0x58] sm:$0xff]  ;;  %s513_s11 = scalar_lea.vmem %s352_s10, 128  ;;  %p518_p9 = scmp.lt.s32.totalorder %s352_s10, %s352_s10 }
  0x19   :  { %450 = vmatprep.subr.bf16.mxu1 %v437_v5  ;;  %424 = vmatprep.mubr.msk.f32.mxu1 %vm48_vm0, %v34_v10  ;;  %v38_v21 = vld [vmem:[#allocation2 + $0x60] sm:$0xff]  ;;  %v31_v22 = vld [vmem:[#allocation2 + $0x28] sm:$0xff]  ;;  %v32_v23 = vld [vmem:[#allocation2 + $0x30] sm:$0xff]  ;;  %p514_p8 = scmp.ne.s32.totalorder %s352_s10, %s513_s11  ;;  %p519_p10 = scmp.lt.s32.totalorder %s513_s11, %s513_s11 }
  0x1a   :  { %v39_v24 = vld [vmem:[#allocation2 + $0x68] sm:$0xff]  ;;  %v33_v25 = vld [vmem:[#allocation2 + $0x38] sm:$0xff] }
  0x1b   :  { %440 = vmatpush3.bf16.msra.mxu0 %v437_v5  ;;  %p520_p11 = por %p519_p10, %p518_p9 }
  0x1c   :  { %442 = vmatprep.subr.bf16.mxu0 %v441_v9  ;;  %454 = vmatpush3.bf16.msra.mxu1 %v437_v5 }
  0x1d   :  { %451 = vmatprep.subr.bf16.mxu1 %v441_v9  ;;  %p521_p12 = pnand %p520_p11, %p514_p8 }
  0x1f   :  { %444 = vmatpush3.bf16.msra.mxu0 %v441_v9 }
  0x20   :  { %446 = vmatprep.subr.bf16.mxu0 %v445_v13  ;;  %455 = vmatpush3.bf16.msra.mxu1 %v441_v9 }
  0x21   :  { %452 = vmatprep.subr.bf16.mxu1 %v445_v13 }
  0x23   :  { %448 = vmatpush3.bf16.msra.mxu0 %v445_v13 }
  0x24   :  { %456 = vmatpush3.bf16.msra.mxu1 %v445_v13 }
  0x26   :  { %413 = vmatmul.mubr.msk.f32.vlgmr.msra.gmra.mrb[0].mxu0 %vm48_vm0, %v27_v14 }
  0x27   :  { %415 = vmatprep.mubr.msk.f32.mxu0 %vm48_vm0, %v28_v15  ;;  %425 = vmatmul.mubr.msk.f32.vlgmr.msra.gmra.mrb[0].mxu1 %vm48_vm0, %v35_v16 }
  0x28   :  { %427 = vmatprep.mubr.msk.f32.mxu1 %vm48_vm0, %v36_v17 }
  0x2a   :  { %416 = vmatmul.mubr.msk.f32.gmra.mrb[2].mxu0 %vm48_vm0, %v29_v18 }
  0x2b   :  { %418 = vmatprep.mubr.msk.f32.mxu0 %vm48_vm0, %v30_v19  ;;  %428 = vmatmul.mubr.msk.f32.gmra.mrb[2].mxu1 %vm48_vm0, %v37_v20 }
  0x2c   :  { %430 = vmatprep.mubr.msk.f32.mxu1 %vm48_vm0, %v38_v21 }
  0x2e   :  { %419 = vmatmul.mubr.msk.f32.gmra.mrb[4].mxu0 %vm48_vm0, %v31_v22 }
  0x2f   :  { %421 = vmatprep.mubr.msk.f32.mxu0 %vm48_vm0, %v32_v23  ;;  %431 = vmatmul.mubr.msk.f32.gmra.mrb[4].mxu1 %vm48_vm0, %v39_v24 }
  0x32   :  { %422 = vmatmul.mubr.msk.f32.gmra.mrb[6].mxu0 %vm48_vm0, %v33_v25 }
  0xf9   :  { %v608_v26 = vpop.f32.mrb[0].mxu0 }
  0xfa   :  { %v610_v27 = vpop.f32.mrb[1].mxu0  ;;  %v612_v28 = vpop.f32.mrb[0].mxu1  ;;  %v227_v31 = vmul.f32 %v608_v26, %v608_v26 }
  0xfb   :  { %v226_v29 = vmul.f32 %v610_v27, %v610_v27  ;;  %v616_v30 = vpop.f32.mrb[1].mxu1  ;;  %v235_v58 = vmul.f32 %v612_v28, %v612_v28 }
  0xfc   :  { %v244_v40 = vsel %vm240_vm1, %v227_v31, 0.0  ;;  %v234_v52 = vmul.f32 %v616_v30, %v616_v30 }
  0xfd   :  { %v620_v32 = vpop.f32.mrb[2].mxu0  ;;  %v241_v33 = vsel %vm240_vm1, %v226_v29, 0.0  ;;  %v268_v63 = vsel %vm240_vm1, %v235_v58, 0.0 }
  0xfe   :  { %242 = vadd.xlane.f32.xlu0 %v241_v33  ;;  %v623_v34 = vpop.f32.mrb[3].mxu0  ;;  %v625_v35 = vpop.f32.mrb[2].mxu1  ;;  %v229_v38 = vmul.f32 %v620_v32, %v620_v32  ;;  %v265_v57 = vsel %vm240_vm1, %v234_v52, 0.0 }
  0xff   :  { %v228_v36 = vmul.f32 %v623_v34, %v623_v34  ;;  %v629_v37 = vpop.f32.mrb[3].mxu1  ;;  %v237_v62 = vmul.f32 %v625_v35, %v625_v35 }
 0x100   :  { %v250_v48 = vsel %vm240_vm1, %v229_v38, 0.0  ;;  %v236_v56 = vmul.f32 %v629_v37, %v629_v37 }
 0x101   :  { %v633_v39 = vpop.f32.mrb[4].mxu0  ;;  %v247_v41 = vsel %vm240_vm1, %v228_v36, 0.0  ;;  %v274_v2 = vsel %vm240_vm1, %v237_v62, 0.0 }
 0x102   :  { %245 = vadd.xlane.f32.xlu0 %v244_v40  ;;  %248 = vadd.xlane.f32.xlu1 %v247_v41  ;;  %v637_v42 = vpop.f32.mrb[5].mxu0  ;;  %v639_v43 = vpop.f32.mrb[4].mxu1  ;;  %v231_v46 = vmul.f32 %v633_v39, %v633_v39  ;;  %v271_v61 = vsel %vm240_vm1, %v236_v56, 0.0 }
 0x103   :  { %v230_v44 = vmul.f32 %v637_v42, %v637_v42  ;;  %v643_v45 = vpop.f32.mrb[5].mxu1  ;;  %v239_v1 = vmul.f32 %v639_v43, %v639_v43 }
 0x104   :  { %v256_v54 = vsel %vm240_vm1, %v231_v46, 0.0  ;;  %v238_v60 = vmul.f32 %v643_v45, %v643_v45 }
 0x105   :  { %v647_v47 = vpop.f32.mrb[6].mxu0  ;;  %v253_v49 = vsel %vm240_vm1, %v230_v44, 0.0  ;;  %v280_v3 = vsel %vm240_vm1, %v239_v1, 0.0 }
 0x106   :  { %251 = vadd.xlane.f32.xlu1 %v250_v48  ;;  %254 = vadd.xlane.f32.xlu0 %v253_v49  ;;  %v651_v50 = vpop.f32.mrb[7].mxu0  ;;  %v233_v53 = vmul.f32 %v647_v47, %v647_v47  ;;  %v277_v0 = vsel %vm240_vm1, %v238_v60, 0.0 }
 0x107   :  { %v232_v51 = vmul.f32 %v651_v50, %v651_v50 }
 0x108   :  { %v262_v59 = vsel %vm240_vm1, %v233_v53, 0.0 }
 0x109   :  { %v259_v55 = vsel %vm240_vm1, %v232_v51, 0.0 }
 0x10a   :  { %257 = vadd.xlane.f32.xlu1 %v256_v54  ;;  %260 = vadd.xlane.f32.xlu0 %v259_v55 }
 0x10e   :  { %263 = vadd.xlane.f32.xlu1 %v262_v59  ;;  %266 = vadd.xlane.f32.xlu0 %v265_v57 }
 0x112   :  { %269 = vadd.xlane.f32.xlu1 %v268_v63  ;;  %272 = vadd.xlane.f32.xlu0 %v271_v61 }
 0x116   :  { %275 = vadd.xlane.f32.xlu1 %v274_v2  ;;  %278 = vadd.xlane.f32.xlu0 %v277_v0 }
 0x11a   :  { %281 = vadd.xlane.f32.xlu1 %v280_v3 }
 0x18b   :  { %v243_v4 = vpop.xlane.xlu0 %242 }
 0x18c   :  { %461 = vrsqrt.f32 %v243_v4 }
 0x18f   :  { %v246_v5 = vpop.xlane.xlu0 %245  ;;  %v249_v6 = vpop.xlane.xlu1 %248 }
 0x190   :  { %463 = vrsqrt.f32 %v246_v5 }
 0x191   :  { %465 = vrsqrt.f32 %v249_v6 }
 0x193   :  { %v252_v7 = vpop.xlane.xlu1 %251  ;;  %v255_v8 = vpop.xlane.xlu0 %254 }
 0x194   :  { %467 = vrsqrt.f32 %v252_v7 }
 0x195   :  { %469 = vrsqrt.f32 %v255_v8 }
 0x196   :  { %v462_v9 = vpop.eup %461 }
 0x197   :  { %v258_v10 = vpop.xlane.xlu1 %257  ;;  %v261_v11 = vpop.xlane.xlu0 %260  ;;  %v297_v12 = vmul.f32 %v462_v9, %v610_v27 }
 0x198   :  { %471 = vrsqrt.f32 %v258_v10 }
 0x199   :  { %473 = vrsqrt.f32 %v261_v11  ;;  %v311_v19 = vsel %vm240_vm1, %v297_v12, 0.0 }
 0x19a   :  { %v464_v13 = vpop.eup %463 }
 0x19b   :  { %v466_v14 = vpop.eup %465  ;;  %v298_v15 = vmul.f32 %v464_v13, %v608_v26  ;;  %v264_v16 = vpop.xlane.xlu1 %263 }
 0x19c   :  { %v267_v17 = vpop.xlane.xlu0 %266  ;;  %v299_v18 = vmul.f32 %v466_v14, %v623_v34  ;;  %475 = vrsqrt.f32 %v264_v16 }
 0x19d   :  { %v312_v20 = vsel %vm240_vm1, %v298_v15, 0.0  ;;  %477 = vrsqrt.f32 %v267_v17 }
 0x19e   :  { %v468_v21 = vpop.eup %467  ;;  %v313_v22 = vadd.f32 %v312_v20, %v311_v19  ;;  %v314_v24 = vsel %vm240_vm1, %v299_v18, 0.0 }
 0x19f   :  { %v470_v23 = vpop.eup %469  ;;  %v300_v25 = vmul.f32 %v468_v21, %v620_v32  ;;  %v270_v27 = vpop.xlane.xlu1 %269 }
 0x1a0   :  { %v273_v29 = vpop.xlane.xlu0 %272  ;;  %v315_v26 = vadd.f32 %v314_v24, %v313_v22  ;;  %v301_v31 = vmul.f32 %v470_v23, %v637_v42  ;;  %479 = vrsqrt.f32 %v270_v27 }
 0x1a1   :  { %v316_v33 = vsel %vm240_vm1, %v300_v25, 0.0  ;;  %481 = vrsqrt.f32 %v273_v29 }
 0x1a2   :  { %v472_v34 = vpop.eup %471  ;;  %v317_v36 = vadd.f32 %v316_v33, %v315_v26  ;;  %v318_v40 = vsel %vm240_vm1, %v301_v31, 0.0 }
 0x1a3   :  { %v474_v38 = vpop.eup %473  ;;  %v302_v41 = vmul.f32 %v472_v34, %v633_v39  ;;  %v276_v44 = vpop.xlane.xlu1 %275 }
 0x1a4   :  { %v279_v46 = vpop.xlane.xlu0 %278  ;;  %v319_v48 = vadd.f32 %v318_v40, %v317_v36  ;;  %v303_v32 = vmul.f32 %v474_v38, %v651_v50  ;;  %483 = vrsqrt.f32 %v276_v44 }
 0x1a5   :  { %v320_v49 = vsel %vm240_vm1, %v302_v41, 0.0  ;;  %485 = vrsqrt.f32 %v279_v46 }
 0x1a6   :  { %v476_v42 = vpop.eup %475  ;;  %v321_v51 = vadd.f32 %v320_v49, %v319_v48  ;;  %v322_v53 = vsel %vm240_vm1, %v303_v32, 0.0 }
 0x1a7   :  { %v478_v52 = vpop.eup %477  ;;  %v304_v54 = vmul.f32 %v476_v42, %v647_v47  ;;  %v282_v55 = vpop.xlane.xlu1 %281 }
 0x1a8   :  { %v323_v56 = vadd.f32 %v322_v53, %v321_v51  ;;  %v305_v39 = vmul.f32 %v478_v52, %v616_v30  ;;  %487 = vrsqrt.f32 %v282_v55 }
 0x1a9   :  { %v324_v57 = vsel %vm240_vm1, %v304_v54, 0.0 }
 0x1aa   :  { %v480_v58 = vpop.eup %479  ;;  %v325_v50 = vadd.f32 %v324_v57, %v323_v56  ;;  %v326_v60 = vsel %vm240_vm1, %v305_v39, 0.0 }
 0x1ab   :  { %v482_v59 = vpop.eup %481  ;;  %v306_v61 = vmul.f32 %v480_v58, %v612_v28 }
 0x1ac   :  { %v307_v62 = vmul.f32 %v482_v59, %v629_v37  ;;  %v327_v63 = vadd.f32 %v326_v60, %v325_v50 }
 0x1ad   :  { %v328_v0 = vsel %vm240_vm1, %v306_v61, 0.0 }
 0x1ae   :  { %v484_v47 = vpop.eup %483  ;;  %v329_v1 = vadd.f32 %v328_v0, %v327_v63  ;;  %v330_v3 = vsel %vm240_vm1, %v307_v62, 0.0 }
 0x1af   :  { %v486_v2 = vpop.eup %485  ;;  %v308_v30 = vmul.f32 %v484_v47, %v625_v35 }
 0x1b0   :  { %v309_v4 = vmul.f32 %v486_v2, %v643_v45  ;;  %v331_v5 = vadd.f32 %v330_v3, %v329_v1 }
 0x1b1   :  { %v332_v6 = vsel %vm240_vm1, %v308_v30, 0.0 }
 0x1b2   :  { %v488_v7 = vpop.eup %487  ;;  %v333_v8 = vadd.f32 %v332_v6, %v331_v5  ;;  %v334_v37 = vsel %vm240_vm1, %v309_v4, 0.0 }
 0x1b3   :  { %v310_v28 = vmul.f32 %v488_v7, %v639_v43 }
 0x1b4   :  { %v335_v9 = vadd.f32 %v334_v37, %v333_v8 }
 0x1b5   :  { %v336_v10 = vsel %vm240_vm1, %v310_v28, 0.0 }
 0x1b6   :  { %v337_v11 = vadd.f32 %v336_v10, %v335_v9 }
 0x1b8   :  { %v338_v12 = vmul.f32 %v337_v11, %v337_v11 }
 0x1ba   :  { %v339_v35 = vsel %vm240_vm1, %v338_v12, 0.0 }
 0x1bb   :  { %340 = vadd.xlane.f32.xlu0 %v339_v35 }
 0x248   :  { %v341_v13 = vpop.xlane.xlu0 %340 }
 0x249   :  { %489 = vrsqrt.f32 %v341_v13 }
 0x253   :  { %v490_v45 = vpop.eup %489 }
 0x254   :  { %v343_v14 = vmul.f32 %v490_v45, %v337_v11 }
 0x256   :  { %344 = vst.msk [vmem:[#allocation5] sm:$0xff] %vm240_vm1, %v343_v14 }
 0x257   :  { %524 = shalt.err (!%p521_p12)
}
 0x258   :  { %s525_s14 = scalar_lea.hbm %s722_s2, 128 }
 0x259   :  { %p526_p13 = scmp.ne.s32.totalorder %s722_s2, %s525_s14  ;;  %p529_p0 = scmp.lt.u32.totalorder %s525_s14, %s722_s2 }
 0x25b   :  { %p531_p1 = pnand %p529_p0, %p526_p13 }
 0x25d   :  { %534 = shalt.err (!%p531_p1)
}
 0x25e   :  { %354 = dma.vmem_to_hbm [thread:$0]  %s352_s10, 128, %s722_s2, [#allocation4]  }
 0x25f   :  { %537 = dma.done.wait [#allocation4], 128  }
 0x260   :  { %538 = vsyncadd [#allocation4], 4294967168 }
 0x261   :  { %358 = vsyncpa [#allocation3], 1 }
 0x262   :  { %359 = vsyncpa [#allocation4], 1 }

</bundles_post_ra>
